<compile_context>
chip_gen: v6e
topology: v6e:2x2x1
jax: 0.10.0
libtpu: 0.0.40
codegen_flags: <defaults>
</compile_context>

<pallas_src>
import math
import functools

import jax
import jax.numpy as jnp
from jax import lax
from jax.experimental import pallas as pl
from jax.experimental.pallas import tpu as pltpu


# ----------------------------------------------------------------------------
# Pallas kernel: per-word LayerNorm(eps=1e-12) on a lane-dense [tn, W*E] block
# ----------------------------------------------------------------------------
def descemb_kernel(x_ref, gamma_ref, beta_ref, avg_ref, o_ref, *, eps):
    # x_ref:      (tn, F) f32   fused embedding sum + positional encoding (F = W*E)
    # gamma/beta: (1, F)  f32   LN affine params tiled per word
    # avg_ref:    (F, F)  bf16  block-diagonal averaging matrix (entries 0 or 1/E,
    #                           both exact in bf16)
    x = x_ref[...]
    avg = avg_ref[...]

    def group_mean(v):
        # Per-word mean broadcast back to all E lanes of its word via the MXU.
        # 2-term bf16 split of the LHS (RHS is exact in bf16) -> ~2^-18 relative
        # error (near-f32) at 1/3 of the MXU passes an f32 HIGHEST matmul needs.
        hi = v.astype(jnp.bfloat16)
        lo = (v - hi.astype(jnp.float32)).astype(jnp.bfloat16)
        return (jnp.dot(hi, avg, preferred_element_type=jnp.float32)
                + jnp.dot(lo, avg, preferred_element_type=jnp.float32))

    mean = group_mean(x)
    centered = x - mean
    var = group_mean(centered * centered)          # per-word biased variance
    x_norm = centered * lax.rsqrt(var + eps)
    o_ref[...] = (x_norm * gamma_ref[...] + beta_ref[...]).astype(o_ref.dtype)


def _round_up(a, b):
    return -(-a // b) * b


def _choose_row_tile(n, *, min_tile=512, max_tile=2048):
    # Small inputs: a single block (block dims == full array dims is always legal).
    # Otherwise aim for ~8 grid programs (>=4 per TensorCore after megacore
    # sharding) while keeping blocks >= min_tile rows (>=512 KiB, amortizes the
    # ~0.35us per-step overhead) and <= max_tile rows (double-buffered in+out
    # blocks stay well under the default scoped-VMEM limits on v5e/v6e/v7x).
    if n <= min_tile:
        return n
    target = _round_up(-(-n // 8), 8)
    return max(min_tile, min(max_tile, target))


def desc_emb_forward(input_ids, type_ids, dpe_ids, params, *, out_dtype=jnp.float32):
    """input_ids/type_ids/dpe_ids: int32 [B, S, W]. Returns out_dtype [B*S, W, E]."""
    B, S, W = input_ids.shape
    E = params["input_emb"].shape[1]
    N = B * S
    F = W * E

    # ---- glue: fused gathers + positional encoding -> ONE lane-dense [N, F] stream.
    # padding_idx=0 semantics come from zeroed table rows.
    # TODO(synk): the id->row gathers stay in XLA; Mosaic has no clean lowering for
    # a dynamic vector gather from a 28K-row VMEM table (a one-hot matmul gather
    # would be far more expensive), so one [N, F] intermediate HBM pass remains.
    x = (params["input_emb"][input_ids]
         + params["type_emb"][type_ids]
         + params["dpe_emb"][dpe_ids]
         + params["pe"][:W][None, None, :, :])
    x = x.reshape(N, F).astype(jnp.float32)

    gamma = jnp.tile(params["ln_gamma"], W).reshape(1, F).astype(jnp.float32)
    beta = jnp.tile(params["ln_beta"], W).reshape(1, F).astype(jnp.float32)

    # Block-diagonal averaging matrix: avg[i, j] = 1/E iff i, j in the same word.
    # Entries 0 and 1/E (power of two) are exact in bf16.
    group = jnp.arange(F, dtype=jnp.int32) // E
    avg = ((group[:, None] == group[None, :]).astype(jnp.float32)
           * (1.0 / float(E))).astype(jnp.bfloat16)

    tn = _choose_row_tile(N)
    grid = (pl.cdiv(N, tn),)   # partial last block: OOB rows masked on the store

    kernel = functools.partial(descemb_kernel, eps=1e-12)

    out = pl.pallas_call(
        kernel,
        out_shape=jax.ShapeDtypeStruct((N, F), out_dtype),
        grid_spec=pltpu.PrefetchScalarGridSpec(
            num_scalar_prefetch=0,
            grid=grid,
            in_specs=[
                pl.BlockSpec((tn, F), lambda i: (i, 0)),   # fused emb sum (+PE)
                pl.BlockSpec((1, F), lambda i: (0, 0)),    # LN gamma (tiled per word)
                pl.BlockSpec((1, F), lambda i: (0, 0)),    # LN beta  (tiled per word)
                pl.BlockSpec((F, F), lambda i: (0, 0)),    # bf16 averaging matrix
            ],
            out_specs=pl.BlockSpec((tn, F), lambda i: (i, 0)),
        ),
        compiler_params=pltpu.CompilerParams(
            dimension_semantics=("parallel",)),
    )(x, gamma, beta, avg)

    return out.reshape(N, W, E)


# ----------------------------------------------------------------------------
# Deterministic parameter construction (mirrors DescEmb.__init__)
# ----------------------------------------------------------------------------
def make_params(key, *, embed_dim, max_word_len,
                input_index_size=28119, type_index_size=14, dpe_index_size=25):
    k1, k2, k3 = jax.random.split(key, 3)
    # nn.Embedding default init ~ N(0, 1); padding_idx=0 row is zero.
    input_emb = jax.random.normal(k1, (input_index_size, embed_dim), jnp.float32)
    input_emb = input_emb.at[0].set(0.0)
    type_emb = jax.random.normal(k2, (type_index_size, embed_dim), jnp.float32)
    type_emb = type_emb.at[0].set(0.0)
    dpe_emb = jax.random.normal(k3, (dpe_index_size, embed_dim), jnp.float32)
    dpe_emb = dpe_emb.at[0].set(0.0)

    # PositionalEncoding buffer
    position = jnp.arange(max_word_len, dtype=jnp.float32)[:, None]
    div_term = jnp.exp(jnp.arange(0, embed_dim, 2, dtype=jnp.float32)
                       * (-math.log(10000.0) / embed_dim))
    pe = jnp.zeros((max_word_len, embed_dim), jnp.float32)
    pe = pe.at[:, 0::2].set(jnp.sin(position * div_term))
    pe = pe.at[:, 1::2].set(jnp.cos(position * div_term))

    # LayerNorm affine params (default init)
    ln_gamma = jnp.ones((embed_dim,), jnp.float32)
    ln_beta = jnp.zeros((embed_dim,), jnp.float32)

    return dict(input_emb=input_emb, type_emb=type_emb, dpe_emb=dpe_emb,
                pe=pe, ln_gamma=ln_gamma, ln_beta=ln_beta)


# ----------------------------------------------------------------------------
# Pure-JAX reference for a sanity check
# ----------------------------------------------------------------------------
def desc_emb_ref(input_ids, type_ids, dpe_ids, params):
    B, S, W = input_ids.shape
    E = params["input_emb"].shape[1]
    x = (params["input_emb"][input_ids]
         + params["type_emb"][type_ids]
         + params["dpe_emb"][dpe_ids]).reshape(B * S, W, E)
    x = x + params["pe"][:W][None]
    mean = jnp.mean(x, axis=-1, keepdims=True)
    var = jnp.mean((x - mean) ** 2, axis=-1, keepdims=True)
    xn = (x - mean) / jnp.sqrt(var + 1e-12)
    return xn * params["ln_gamma"] + params["ln_beta"]


if __name__ == "__main__":
    # Forward-consistent small shapes: args.embed_dim=32, args.max_word_len=8,
    # args.type_token=True, args.dpe=True, args.pos_enc=True, eval mode.
    # TODO(synk): training-mode dropout inside PositionalEncoding is not
    # implemented (eval-mode identity semantics are used).
    B, S, W, E = 2, 4, 8, 32

    key = jax.random.PRNGKey(0)
    kp, ki, kt, kd = jax.random.split(key, 4)
    params = make_params(kp, embed_dim=E, max_word_len=W)

    input_ids = jax.random.randint(ki, (B, S, W), 0, 28119, dtype=jnp.int32)
    type_ids = jax.random.randint(kt, (B, S, W), 0, 14, dtype=jnp.int32)
    dpe_ids = jax.random.randint(kd, (B, S, W), 0, 25, dtype=jnp.int32)

    fwd = jax.jit(desc_emb_forward)

    out = jax.block_until_ready(fwd(input_ids, type_ids, dpe_ids, params))
    ref = desc_emb_ref(input_ids, type_ids, dpe_ids, params)
    assert out.shape == (B * S, W, E), out.shape
    assert jnp.allclose(out, ref, atol=2e-4, rtol=2e-4), \
        float(jnp.max(jnp.abs(out - ref)))

    # Multi-tile check: N=576 rows with tile=512 exercises the multi-program
    # grid (megacore sharding) and the masked partial last-block store.
    B2, S2 = 16, 36
    k5, k6, k7 = jax.random.split(jax.random.PRNGKey(1), 3)
    ii2 = jax.random.randint(k5, (B2, S2, W), 0, 28119, dtype=jnp.int32)
    ti2 = jax.random.randint(k6, (B2, S2, W), 0, 14, dtype=jnp.int32)
    di2 = jax.random.randint(k7, (B2, S2, W), 0, 25, dtype=jnp.int32)
    out2 = jax.block_until_ready(fwd(ii2, ti2, di2, params))
    ref2 = desc_emb_ref(ii2, ti2, di2, params)
    assert out2.shape == (B2 * S2, W, E), out2.shape
    assert jnp.allclose(out2, ref2, atol=2e-4, rtol=2e-4), \
        float(jnp.max(jnp.abs(out2 - ref2)))

    print("KERNEL_OK")
</pallas_src>

<mosaic_0001>
module attributes {stable_mosaic.version = 11 : i64} {
  func.func @descemb_kernel(%arg0: i32, %arg1: memref<8x256xf32, #tpu.memory_space<vmem>>, %arg2: memref<1x256xf32, #tpu.memory_space<vmem>>, %arg3: memref<1x256xf32, #tpu.memory_space<vmem>>, %arg4: memref<256x256xbf16, #tpu.memory_space<vmem>>, %arg5: memref<8x256xf32, #tpu.memory_space<vmem>>) attributes {dimension_semantics = [#tpu.dimension_semantics<parallel>], iteration_bounds = array<i64: 1>, scalar_prefetch = 0 : i64, scratch_operands = 0 : i64, tpu.core_type = #tpu.core_type<tc>, window_params = [{transform_indices = @transform_0, window_bounds = array<i64: 8, 256>}, {pipeline_mode = #tpu.pipeline_mode<synchronous>, transform_indices = @transform_1, window_bounds = array<i64: 1, 256>}, {pipeline_mode = #tpu.pipeline_mode<synchronous>, transform_indices = @transform_2, window_bounds = array<i64: 1, 256>}, {pipeline_mode = #tpu.pipeline_mode<synchronous>, transform_indices = @transform_3, window_bounds = array<i64: 256, 256>}, {transform_indices = @transform_4, window_bounds = array<i64: 8, 256>}]} {
    %c0 = arith.constant 0 : index
    %c0_0 = arith.constant 0 : index
    %0 = vector.load %arg1[%c0, %c0_0] : memref<8x256xf32, #tpu.memory_space<vmem>>, vector<8x256xf32>
    %c0_1 = arith.constant 0 : index
    %c0_2 = arith.constant 0 : index
    %1 = vector.load %arg4[%c0_1, %c0_2] : memref<256x256xbf16, #tpu.memory_space<vmem>>, vector<256x256xbf16>
    %2 = arith.truncf %0 : vector<8x256xf32> to vector<8x256xbf16>
    %3 = arith.extf %2 : vector<8x256xbf16> to vector<8x256xf32>
    %4 = arith.subf %0, %3 : vector<8x256xf32>
    %5 = arith.truncf %4 : vector<8x256xf32> to vector<8x256xbf16>
    %cst = arith.constant dense<0.000000e+00> : vector<8x256xf32>
    %6 = tpu.matmul %2, %1, %cst {dimension_numbers = #tpu.dot_dimension_numbers<[1], [0], [0], [1], [0, 0, 1, 1], [], []>} : vector<8x256xbf16>, vector<256x256xbf16>, vector<8x256xf32> -> vector<8x256xf32>
    %cst_3 = arith.constant dense<0.000000e+00> : vector<8x256xf32>
    %7 = tpu.matmul %5, %1, %cst_3 {dimension_numbers = #tpu.dot_dimension_numbers<[1], [0], [0], [1], [0, 0, 1, 1], [], []>} : vector<8x256xbf16>, vector<256x256xbf16>, vector<8x256xf32> -> vector<8x256xf32>
    %8 = arith.addf %6, %7 : vector<8x256xf32>
    %9 = arith.subf %0, %8 : vector<8x256xf32>
    %10 = arith.mulf %9, %9 : vector<8x256xf32>
    %11 = arith.truncf %10 : vector<8x256xf32> to vector<8x256xbf16>
    %12 = arith.extf %11 : vector<8x256xbf16> to vector<8x256xf32>
    %13 = arith.subf %10, %12 : vector<8x256xf32>
    %14 = arith.truncf %13 : vector<8x256xf32> to vector<8x256xbf16>
    %cst_4 = arith.constant dense<0.000000e+00> : vector<8x256xf32>
    %15 = tpu.matmul %11, %1, %cst_4 {dimension_numbers = #tpu.dot_dimension_numbers<[1], [0], [0], [1], [0, 0, 1, 1], [], []>} : vector<8x256xbf16>, vector<256x256xbf16>, vector<8x256xf32> -> vector<8x256xf32>
    %cst_5 = arith.constant dense<0.000000e+00> : vector<8x256xf32>
    %16 = tpu.matmul %14, %1, %cst_5 {dimension_numbers = #tpu.dot_dimension_numbers<[1], [0], [0], [1], [0, 0, 1, 1], [], []>} : vector<8x256xbf16>, vector<256x256xbf16>, vector<8x256xf32> -> vector<8x256xf32>
    %17 = arith.addf %15, %16 : vector<8x256xf32>
    %cst_6 = arith.constant 9.99999996E-13 : f32
    %18 = vector.broadcast %cst_6 : f32 to vector<8x256xf32>
    %19 = arith.addf %17, %18 : vector<8x256xf32>
    %20 = math.rsqrt %19 : vector<8x256xf32>
    %21 = arith.mulf %9, %20 : vector<8x256xf32>
    %c0_7 = arith.constant 0 : index
    %c0_8 = arith.constant 0 : index
    %22 = vector.load %arg2[%c0_7, %c0_8] : memref<1x256xf32, #tpu.memory_space<vmem>>, vector<1x256xf32>
    %23 = vector.broadcast %22 : vector<1x256xf32> to vector<8x256xf32>
    %24 = arith.mulf %21, %23 : vector<8x256xf32>
    %c0_9 = arith.constant 0 : index
    %c0_10 = arith.constant 0 : index
    %25 = vector.load %arg3[%c0_9, %c0_10] : memref<1x256xf32, #tpu.memory_space<vmem>>, vector<1x256xf32>
    %26 = vector.broadcast %25 : vector<1x256xf32> to vector<8x256xf32>
    %27 = arith.addf %24, %26 : vector<8x256xf32>
    %c0_11 = arith.constant 0 : index
    %c0_12 = arith.constant 0 : index
    %28 = vector.load %arg5[%c0_11, %c0_12] : memref<8x256xf32, #tpu.memory_space<vmem>>, vector<8x256xf32>
    tpu.vector_store %arg5[%c0_11, %c0_12], %27 {strides = array<i32>} : memref<8x256xf32, #tpu.memory_space<vmem>>, vector<8x256xf32>,
    return
  }
  func.func @transform_0(%arg0: i32) -> (i32, i32) {
    %c0_i32 = arith.constant 0 : i32
    %c0_i32_0 = arith.constant 0 : i32
    return %arg0, %c0_i32 : i32, i32
  }
  func.func @transform_1(%arg0: i32) -> (i32, i32) {
    %c0_i32 = arith.constant 0 : i32
    %c0_i32_0 = arith.constant 0 : i32
    %c0_i32_1 = arith.constant 0 : i32
    return %c0_i32, %c0_i32_0 : i32, i32
  }
  func.func @transform_2(%arg0: i32) -> (i32, i32) {
    %c0_i32 = arith.constant 0 : i32
    %c0_i32_0 = arith.constant 0 : i32
    %c0_i32_1 = arith.constant 0 : i32
    return %c0_i32, %c0_i32_0 : i32, i32
  }
  func.func @transform_3(%arg0: i32) -> (i32, i32) {
    %c0_i32 = arith.constant 0 : i32
    %c0_i32_0 = arith.constant 0 : i32
    %c0_i32_1 = arith.constant 0 : i32
    return %c0_i32, %c0_i32_0 : i32, i32
  }
  func.func @transform_4(%arg0: i32) -> (i32, i32) {
    %c0_i32 = arith.constant 0 : i32
    %c0_i32_0 = arith.constant 0 : i32
    return %arg0, %c0_i32 : i32, i32
  }
}

</mosaic_0001>

<bundles_post_ra>
// kernel: tile.13
= control target key start
LH: loop header
LB: loop body
LE: loop exit
PB: predicated region body
PF: predicated region fallthrough
CT: control target
= control target key end

     0   :  { %s22_s0 = inlined_call_operand.vmem [shape: f32[32], index: 0, kind: input, shape index: {}]   ;;  %s23_s1 = inlined_call_operand.vmem [shape: f32[8,32], index: 1, kind: output, shape index: {}]  }
   0x1   :  { %v4_v0 = vld [vmem:[%s22_s0] ss:$0 sm:$0xff] }
   0x2   :  { %5 = vst [vmem:[%s23_s1] sm:$0xff] %v4_v0 }

// kernel: tile.14
= control target key start
LH: loop header
LB: loop body
LE: loop exit
PB: predicated region body
PF: predicated region fallthrough
CT: control target
= control target key end

     0   :  { %s7_s6 = smov 3  ;;  %s14_s9 = smov 3  ;;  %vm4_vm0 = vcmask 261120   ;;  %vm11_vm1 = vcmask 1048320   ;;  %vm18_vm2 = vcmask 785920   ;;  %vm25_vm3 = vcmask 523520   ;;  %s79_s0 = inlined_call_operand.vmem [shape: f32[8,32], index: 0, kind: input, shape index: {}]   ;;  %s80_s1 = inlined_call_operand.vmem [shape: f32[1,256], index: 1, kind: output, shape index: {}]  }
   0x1   :  { %v41_v0 = vld [vmem:[%s79_s0 + $0x3] ss:$4 sm:%s7_s6]   ;;  %s48_s10 = smov 96   ;;  %s21_s11 = smov 3  ;;  %v42_v1 = vld [vmem:[%s79_s0 + $0x2] ss:$4 sm:%s14_s9]  }
   0x2   :  { %9 = vrot.lane.b32.xlu0 %v41_v0, %s48_s10  ;;  %v43_v2 = vld [vmem:[%s79_s0 + $0x1] ss:$4 sm:%s21_s11]   ;;  %s2_s16 = smov 3  ;;  %s49_s17 = smov 32  }
   0x3   :  { %23 = vrot.lane.b32.xlu1 %v43_v2, %s49_s17  ;;  %v3_v3 = vld [vmem:[%s79_s0] ss:$4 sm:%s2_s16]   ;;  %s50_s0 = smov 64  }
   0x4   :  { %5 = vst.msk [vmem:[#allocation0] ss:$8 sm:$0x3] %vm4_vm0, %v3_v3  }
   0x6   :  { %16 = vrot.lane.b32.xlu0 %v42_v1, %s50_s0 }
  0x74   :  { %v10_v4 = vpop.permute.xlu0 %9  }
  0x75   :  { %12 = vst.msk [vmem:[#allocation0] ss:$8 sm:$0x3] %vm11_vm1, %v10_v4   ;;  %v24_v5 = vpop.permute.xlu1 %23  }
  0x78   :  { %v17_v6 = vpop.permute.xlu0 %16  }
  0x79   :  { %19 = vst.msk [vmem:[#allocation0] ss:$8 sm:$0x3] %vm18_vm2, %v17_v6  }
  0x7a   :  { %26 = vst.msk [vmem:[#allocation0] ss:$8 sm:$0x3] %vm25_vm3, %v24_v5  }
  0x81   :  { %v31_v7 = vld [vmem:[#allocation0] sm:$0x1]  ;;  %v36_v8 = vld [vmem:[#allocation0 + $0x8] sm:$0x1] }
  0x82   :  { %34 = vst [vmem:[%s80_s1] sm:$0x1] %v31_v7  ;;  %44 = vst [vmem:[%s80_s1 + $0x1] sm:$0x1] %v36_v8 }

// kernel: desc_emb_forward.1
= control target key start
LH: loop header
LB: loop body
LE: loop exit
PB: predicated region body
PF: predicated region fallthrough
CT: control target
= control target key end

     0   :  { %s862_s3 = inlined_call_operand.vmem [shape: bf16[256,256], index: 3, kind: input, shape index: {}]   ;;  %s863_s0 = inlined_call_operand.vmem [shape: f32[8,256], index: 0, kind: input, shape index: {}]   ;;  %s864_s1 = inlined_call_operand.vmem [shape: f32[1,256], index: 1, kind: input, shape index: {}]   ;;  %s865_s2 = inlined_call_operand.vmem [shape: f32[1,256], index: 2, kind: input, shape index: {}]   ;;  %s866_s4 = inlined_call_operand.vmem [shape: f32[8,256], index: 4, kind: output, shape index: {}]  }
   0x1   :  { %v547_v0 = vld [vmem:[%s862_s3 + $0x74] ss:$8 sps:$4 sm:$0xff]   ;;  %v552_v1 = vld [vmem:[%s862_s3 + $0x70] ss:$8 sps:$4 sm:$0xff]   ;;  %v559_v2 = vld [vmem:[%s862_s3 + $0x64] ss:$8 sps:$4 sm:$0xff]  }
   0x2   :  { %219 = vmatprep.subr.bf16.mxu0 %v547_v0  ;;  %260 = vmatprep.subr.bf16.mxu1 %v547_v0  ;;  %v566_v3 = vld [vmem:[%s862_s3 + $0x60] ss:$8 sps:$4 sm:$0xff]   ;;  %v573_v4 = vld [vmem:[%s862_s3 + $0x54] ss:$8 sps:$4 sm:$0xff]   ;;  %v580_v5 = vld [vmem:[%s862_s3 + $0x50] ss:$8 sps:$4 sm:$0xff]  }
   0x3   :  { %220 = vmatpush1.bf16.msra.mxu0 %v552_v1  ;;  %261 = vmatpush1.bf16.msra.mxu1 %v552_v1  ;;  %v587_v6 = vld [vmem:[%s862_s3 + $0x44] ss:$8 sps:$4 sm:$0xff]   ;;  %v594_v7 = vld [vmem:[%s862_s3 + $0x40] ss:$8 sps:$4 sm:$0xff]   ;;  %v601_v8 = vld [vmem:[%s862_s3 + $0x34] ss:$8 sps:$4 sm:$0xff]  }
   0x4   :  { %221 = vmatprep.subr.bf16.mxu0 %v559_v2  ;;  %262 = vmatprep.subr.bf16.mxu1 %v559_v2  ;;  %v608_v9 = vld [vmem:[%s862_s3 + $0x30] ss:$8 sps:$4 sm:$0xff]   ;;  %v615_v10 = vld [vmem:[%s862_s3 + $0x24] ss:$8 sps:$4 sm:$0xff]   ;;  %v622_v11 = vld [vmem:[%s862_s3 + $0x20] ss:$8 sps:$4 sm:$0xff]  }
   0x5   :  { %v629_v12 = vld [vmem:[%s862_s3 + $0x14] ss:$8 sps:$4 sm:$0xff]   ;;  %v634_v13 = vld [vmem:[%s863_s0 + $0x8] sm:$0xff]  ;;  %v643_v15 = vld [vmem:[%s862_s3 + $0x10] ss:$8 sps:$4 sm:$0xff]  }
   0x6   :  { %v52_v14 = vpack.c.bf16 %v634_v13, %v634_v13  ;;  %v650_v16 = vld [vmem:[%s862_s3 + $0x4] ss:$8 sps:$4 sm:$0xff]   ;;  %v658_v19 = vld [vmem:[%s862_s3] ss:$8 sps:$4 sm:$0xff]   ;;  %v665_v20 = vld [vmem:[%s862_s3 + $0xf4] ss:$8 sps:$4 sm:$0xff]  }
   0x7   :  { %222 = vmatpush1.bf16.msra.mxu0 %v566_v3  ;;  %263 = vmatpush1.bf16.msra.mxu1 %v566_v3  ;;  %v672_v22 = vld [vmem:[%s862_s3 + $0xf0] ss:$8 sps:$4 sm:$0xff]   ;;  %v679_v23 = vld [vmem:[%s862_s3 + $0xe4] ss:$8 sps:$4 sm:$0xff]   ;;  %v686_v24 = vld [vmem:[%s862_s3 + $0xe0] ss:$8 sps:$4 sm:$0xff]  }
   0x8   :  { %223 = vmatprep.subr.bf16.mxu0 %v573_v4  ;;  %264 = vmatprep.subr.bf16.mxu1 %v573_v4  ;;  %v54_v17 = vunpack.c.l.bf16 %v52_v14  ;;  %v693_v25 = vld [vmem:[%s862_s3 + $0xd4] ss:$8 sps:$4 sm:$0xff]   ;;  %v700_v26 = vld [vmem:[%s862_s3 + $0xd0] ss:$8 sps:$4 sm:$0xff]   ;;  %v707_v27 = vld [vmem:[%s862_s3 + $0xc4] ss:$8 sps:$4 sm:$0xff]  }
   0x9   :  { %292 = vmatprep.mubr.bf16.mxu1 %v52_v14  ;;  %v714_v28 = vld [vmem:[%s862_s3 + $0xc0] ss:$8 sps:$4 sm:$0xff]   ;;  %v721_v29 = vld [vmem:[%s862_s3 + $0xb4] ss:$8 sps:$4 sm:$0xff]   ;;  %v728_v30 = vld [vmem:[%s862_s3 + $0xb0] ss:$8 sps:$4 sm:$0xff]  }
   0xa   :  { %v56_v18 = vsub.f32 %v634_v13, %v54_v17  ;;  %v733_v31 = vld [vmem:[%s863_s0] sm:$0xff]  ;;  %v756_v35 = vld [vmem:[%s862_s3 + $0x94] ss:$8 sps:$4 sm:$0xff]   ;;  %v763_v37 = vld [vmem:[%s862_s3 + $0x90] ss:$8 sps:$4 sm:$0xff]  }
   0xb   :  { %224 = vmatpush1.bf16.msra.mxu0 %v580_v5  ;;  %265 = vmatpush1.bf16.msra.mxu1 %v580_v5  ;;  %v740_v32 = vld [vmem:[%s862_s3 + $0xa4] ss:$8 sps:$4 sm:$0xff]   ;;  %v51_v33 = vpack.c.bf16 %v733_v31, %v733_v31  ;;  %v749_v34 = vld [vmem:[%s862_s3 + $0xa0] ss:$8 sps:$4 sm:$0xff]  }
   0xc   :  { %225 = vmatprep.subr.bf16.mxu0 %v587_v6  ;;  %266 = vmatprep.subr.bf16.mxu1 %v587_v6  ;;  %v58_v21 = vpack.c.bf16 %v56_v18, %v56_v18  ;;  %v770_v38 = vld [vmem:[%s862_s3 + $0x84] ss:$8 sps:$4 sm:$0xff]   ;;  %v778_v40 = vld [vmem:[%s862_s3 + $0x80] ss:$8 sps:$4 sm:$0xff]  }
   0xd   :  { %v53_v36 = vunpack.c.l.bf16 %v51_v33  ;;  %v415_v17 = vld [vmem:[%s865_s2] sm:$0x3] }
   0xe   :  { %251 = vmatprep.mubr.bf16.mxu0 %v58_v21 }
   0xf   :  { %226 = vmatpush1.bf16.msra.mxu0 %v594_v7  ;;  %267 = vmatpush1.bf16.msra.mxu1 %v594_v7  ;;  %v55_v39 = vsub.f32 %v733_v31, %v53_v36 }
  0x10   :  { %227 = vmatprep.subr.bf16.mxu0 %v601_v8  ;;  %268 = vmatprep.subr.bf16.mxu1 %v601_v8 }
  0x11   :  { %v57_v41 = vpack.c.bf16 %v55_v39, %v55_v39 }
  0x13   :  { %228 = vmatpush1.bf16.msra.mxu0 %v608_v9  ;;  %269 = vmatpush1.bf16.msra.mxu1 %v608_v9 }
  0x14   :  { %229 = vmatprep.subr.bf16.mxu0 %v615_v10  ;;  %270 = vmatprep.subr.bf16.mxu1 %v615_v10 }
  0x17   :  { %230 = vmatpush1.bf16.msra.mxu0 %v622_v11  ;;  %271 = vmatpush1.bf16.msra.mxu1 %v622_v11 }
  0x18   :  { %231 = vmatprep.subr.bf16.mxu0 %v629_v12  ;;  %272 = vmatprep.subr.bf16.mxu1 %v629_v12 }
  0x1b   :  { %232 = vmatpush1.bf16.msra.mxu0 %v643_v15  ;;  %273 = vmatpush1.bf16.msra.mxu1 %v643_v15 }
  0x1c   :  { %233 = vmatprep.subr.bf16.mxu0 %v650_v16  ;;  %274 = vmatprep.subr.bf16.mxu1 %v650_v16 }
  0x1f   :  { %234 = vmatpush1.bf16.msra.mxu0 %v658_v19  ;;  %275 = vmatpush1.bf16.msra.mxu1 %v658_v19 }
  0x20   :  { %235 = vmatprep.subr.bf16.mxu0 %v665_v20  ;;  %276 = vmatprep.subr.bf16.mxu1 %v665_v20 }
  0x23   :  { %236 = vmatpush2.bf16.msra.mxu0 %v672_v22  ;;  %277 = vmatpush2.bf16.msra.mxu1 %v672_v22 }
  0x24   :  { %237 = vmatprep.subr.bf16.mxu0 %v679_v23  ;;  %278 = vmatprep.subr.bf16.mxu1 %v679_v23 }
  0x27   :  { %238 = vmatpush2.bf16.msra.mxu0 %v686_v24  ;;  %279 = vmatpush2.bf16.msra.mxu1 %v686_v24 }
  0x28   :  { %239 = vmatprep.subr.bf16.mxu0 %v693_v25  ;;  %280 = vmatprep.subr.bf16.mxu1 %v693_v25 }
  0x2b   :  { %240 = vmatpush2.bf16.msra.mxu0 %v700_v26  ;;  %281 = vmatpush2.bf16.msra.mxu1 %v700_v26 }
  0x2c   :  { %241 = vmatprep.subr.bf16.mxu0 %v707_v27  ;;  %282 = vmatprep.subr.bf16.mxu1 %v707_v27 }
  0x2f   :  { %242 = vmatpush2.bf16.msra.mxu0 %v714_v28  ;;  %283 = vmatpush2.bf16.msra.mxu1 %v714_v28 }
  0x30   :  { %243 = vmatprep.subr.bf16.mxu0 %v721_v29  ;;  %284 = vmatprep.subr.bf16.mxu1 %v721_v29 }
  0x33   :  { %244 = vmatpush2.bf16.msra.mxu0 %v728_v30  ;;  %285 = vmatpush2.bf16.msra.mxu1 %v728_v30 }
  0x34   :  { %245 = vmatprep.subr.bf16.mxu0 %v740_v32  ;;  %286 = vmatprep.subr.bf16.mxu1 %v740_v32 }
  0x37   :  { %246 = vmatpush2.bf16.msra.mxu0 %v749_v34  ;;  %287 = vmatpush2.bf16.msra.mxu1 %v749_v34 }
  0x38   :  { %247 = vmatprep.subr.bf16.mxu0 %v756_v35  ;;  %288 = vmatprep.subr.bf16.mxu1 %v756_v35 }
  0x3b   :  { %248 = vmatpush2.bf16.msra.mxu0 %v763_v37  ;;  %289 = vmatpush2.bf16.msra.mxu1 %v763_v37 }
  0x3c   :  { %249 = vmatprep.subr.bf16.mxu0 %v770_v38  ;;  %290 = vmatprep.subr.bf16.mxu1 %v770_v38 }
  0x3f   :  { %250 = vmatpush2.bf16.msra.mxu0 %v778_v40  ;;  %291 = vmatpush2.bf16.msra.mxu1 %v778_v40 }
  0x40   :  { %354 = vmatprep.subr.bf16.mxu1 %v547_v0  ;;  %313 = vmatprep.subr.bf16.mxu0 %v547_v0 }
  0x42   :  { %252 = vmatmul.mubr.bf16.vlgmr.msra.gmra.mxu0 %v57_v41  ;;  %293 = vmatmul.mubr.bf16.vlgmr.msra.gmra.mxu1 %v51_v33 }
  0x43   :  { %355 = vmatpush1.bf16.msra.mxu1 %v552_v1  ;;  %314 = vmatpush1.bf16.msra.mxu0 %v552_v1 }
  0x44   :  { %356 = vmatprep.subr.bf16.mxu1 %v559_v2  ;;  %315 = vmatprep.subr.bf16.mxu0 %v559_v2 }
  0x47   :  { %357 = vmatpush1.bf16.msra.mxu1 %v566_v3  ;;  %316 = vmatpush1.bf16.msra.mxu0 %v566_v3 }
  0x48   :  { %358 = vmatprep.subr.bf16.mxu1 %v573_v4  ;;  %317 = vmatprep.subr.bf16.mxu0 %v573_v4 }
  0x4b   :  { %359 = vmatpush1.bf16.msra.mxu1 %v580_v5  ;;  %318 = vmatpush1.bf16.msra.mxu0 %v580_v5 }
  0x4c   :  { %360 = vmatprep.subr.bf16.mxu1 %v587_v6  ;;  %319 = vmatprep.subr.bf16.mxu0 %v587_v6 }
  0x4f   :  { %361 = vmatpush1.bf16.msra.mxu1 %v594_v7  ;;  %320 = vmatpush1.bf16.msra.mxu0 %v594_v7 }
  0x50   :  { %362 = vmatprep.subr.bf16.mxu1 %v601_v8  ;;  %321 = vmatprep.subr.bf16.mxu0 %v601_v8 }
  0x53   :  { %363 = vmatpush1.bf16.msra.mxu1 %v608_v9  ;;  %322 = vmatpush1.bf16.msra.mxu0 %v608_v9 }
  0x54   :  { %364 = vmatprep.subr.bf16.mxu1 %v615_v10  ;;  %323 = vmatprep.subr.bf16.mxu0 %v615_v10  ;;  %v403_v10 = vlaneseq }
  0x57   :  { %365 = vmatpush1.bf16.msra.mxu1 %v622_v11  ;;  %324 = vmatpush1.bf16.msra.mxu0 %v622_v11 }
  0x58   :  { %366 = vmatprep.subr.bf16.mxu1 %v629_v12  ;;  %325 = vmatprep.subr.bf16.mxu0 %v629_v12 }
  0x5b   :  { %367 = vmatpush1.bf16.msra.mxu1 %v643_v15  ;;  %326 = vmatpush1.bf16.msra.mxu0 %v643_v15  ;;  %v401_v15 = vld [vmem:[%s864_s1] sm:$0x3] }
  0x5c   :  { %368 = vmatprep.subr.bf16.mxu1 %v650_v16  ;;  %327 = vmatprep.subr.bf16.mxu0 %v650_v16 }
  0x5f   :  { %369 = vmatpush1.bf16.msra.mxu1 %v658_v19  ;;  %328 = vmatpush1.bf16.msra.mxu0 %v658_v19 }
  0x60   :  { %370 = vmatprep.subr.bf16.mxu1 %v665_v20  ;;  %329 = vmatprep.subr.bf16.mxu0 %v665_v20 }
  0x63   :  { %371 = vmatpush2.bf16.msra.mxu1 %v672_v22  ;;  %330 = vmatpush2.bf16.msra.mxu0 %v672_v22 }
  0x64   :  { %372 = vmatprep.subr.bf16.mxu1 %v679_v23  ;;  %331 = vmatprep.subr.bf16.mxu0 %v679_v23 }
  0x67   :  { %373 = vmatpush2.bf16.msra.mxu1 %v686_v24  ;;  %332 = vmatpush2.bf16.msra.mxu0 %v686_v24 }
  0x68   :  { %374 = vmatprep.subr.bf16.mxu1 %v693_v25  ;;  %333 = vmatprep.subr.bf16.mxu0 %v693_v25 }
  0x6b   :  { %375 = vmatpush2.bf16.msra.mxu1 %v700_v26  ;;  %334 = vmatpush2.bf16.msra.mxu0 %v700_v26 }
  0x6c   :  { %376 = vmatprep.subr.bf16.mxu1 %v707_v27  ;;  %335 = vmatprep.subr.bf16.mxu0 %v707_v27 }
  0x6f   :  { %377 = vmatpush2.bf16.msra.mxu1 %v714_v28  ;;  %336 = vmatpush2.bf16.msra.mxu0 %v714_v28 }
  0x70   :  { %378 = vmatprep.subr.bf16.mxu1 %v721_v29  ;;  %337 = vmatprep.subr.bf16.mxu0 %v721_v29 }
  0x73   :  { %379 = vmatpush2.bf16.msra.mxu1 %v728_v30  ;;  %338 = vmatpush2.bf16.msra.mxu0 %v728_v30 }
  0x74   :  { %380 = vmatprep.subr.bf16.mxu1 %v740_v32  ;;  %339 = vmatprep.subr.bf16.mxu0 %v740_v32 }
  0x77   :  { %381 = vmatpush2.bf16.msra.mxu1 %v749_v34  ;;  %340 = vmatpush2.bf16.msra.mxu0 %v749_v34 }
  0x78   :  { %382 = vmatprep.subr.bf16.mxu1 %v756_v35  ;;  %341 = vmatprep.subr.bf16.mxu0 %v756_v35 }
  0x7b   :  { %383 = vmatpush2.bf16.msra.mxu1 %v763_v37  ;;  %342 = vmatpush2.bf16.msra.mxu0 %v763_v37 }
  0x7c   :  { %384 = vmatprep.subr.bf16.mxu1 %v770_v38  ;;  %343 = vmatprep.subr.bf16.mxu0 %v770_v38 }
  0x7f   :  { %385 = vmatpush2.bf16.msra.mxu1 %v778_v40  ;;  %344 = vmatpush2.bf16.msra.mxu0 %v778_v40 }
 0x102   :  { %v253_v42 = vpop.f32.mrf.mxu0  ;;  %v294_v43 = vpop.f32.mrf.mxu1 }
 0x103   :  { %v295_v44 = vadd.f32 %v294_v43, %v253_v42 }
 0x104   :  { %v255_v45 = vpop.f32.mrf.mxu0  ;;  %v296_v46 = vpop.f32.mrf.mxu1 }
 0x105   :  { %v301_v47 = vsub.f32 %v733_v31, %v295_v44  ;;  %v297_v48 = vadd.f32 %v296_v46, %v255_v45 }
 0x106   :  { %v257_v49 = vpop.f32.mrf.mxu0  ;;  %v298_v50 = vpop.f32.mrf.mxu1 }
 0x107   :  { %v303_v51 = vmul.f32 %v301_v47, %v301_v47  ;;  %v302_v52 = vsub.f32 %v634_v13, %v297_v48  ;;  %v404_v13 = vshrl.u32 %v403_v10, 7 }
 0x108   :  { %v258_v53 = vpop.f32.mrf.mxu0  ;;  %v299_v54 = vpop.f32.mrf.mxu1 }
 0x109   :  { %v305_v55 = vpack.c.bf16 %v303_v51, %v303_v51  ;;  %v304_v56 = vmul.f32 %v302_v52, %v302_v52  ;;  %v405_v14 = vsub.s32 0, %v404_v13  ;;  %v409_v16 = vsub.s32 1, %v404_v13 }
 0x10b   :  { %v307_v57 = vunpack.c.l.bf16 %v305_v55  ;;  %v306_v58 = vpack.c.bf16 %v304_v56, %v304_v56  ;;  %v406_v18 = vrot.slane %v401_v15, %v405_v14  ;;  %v420_v21 = vrot.slane %v415_v17, %v405_v14 }
 0x10c   :  { %v410_v22 = vrot.slane %v401_v15, %v409_v16  ;;  %v424_v26 = vrot.slane %v415_v17, %v409_v16 }
 0x10d   :  { %v308_v59 = vunpack.c.l.bf16 %v306_v58  ;;  %386 = vmatprep.mubr.bf16.mxu1 %v306_v58  ;;  %v309_v60 = vsub.f32 %v303_v51, %v307_v57 }
 0x10e   :  { %387 = vmatmul.mubr.bf16.vlgmr.msra.gmra.mxu1 %v305_v55 }
 0x10f   :  { %v310_v61 = vsub.f32 %v304_v56, %v308_v59  ;;  %v311_v63 = vpack.c.bf16 %v309_v60, %v309_v60 }
 0x111   :  { %v312_v62 = vpack.c.bf16 %v310_v61, %v310_v61 }
 0x113   :  { %345 = vmatprep.mubr.bf16.mxu0 %v312_v62 }
 0x114   :  { %346 = vmatmul.mubr.bf16.vlgmr.msra.gmra.mxu0 %v311_v63 }
 0x1ce   :  { %v388_v0 = vpop.f32.mrf.mxu1 }
 0x1d0   :  { %v390_v1 = vpop.f32.mrf.mxu1 }
 0x1d2   :  { %v392_v2 = vpop.f32.mrf.mxu1 }
 0x1d4   :  { %v347_v3 = vpop.f32.mrf.mxu0  ;;  %v393_v4 = vpop.f32.mrf.mxu1 }
 0x1d5   :  { %v389_v5 = vadd.f32 %v388_v0, %v347_v3 }
 0x1d6   :  { %v349_v6 = vpop.f32.mrf.mxu0 }
 0x1d7   :  { %v395_v7 = vadd.f32 1e-12, %v389_v5  ;;  %v391_v8 = vadd.f32 %v390_v1, %v349_v6 }
 0x1d8   :  { %v351_v9 = vpop.f32.mrf.mxu0 }
 0x1d9   :  { %515 = vrsqrt.f32 %v395_v7  ;;  %v396_v11 = vadd.f32 1e-12, %v391_v8 }
 0x1da   :  { %v352_v12 = vpop.f32.mrf.mxu0 }
 0x1db   :  { %517 = vrsqrt.f32 %v396_v11 }
 0x1e6   :  { %v516_v19 = vpop.eup %515 }
 0x1e7   :  { %v399_v20 = vmul.f32 %v516_v19, %v301_v47 }
 0x1e8   :  { %v518_v23 = vpop.eup %517 }
 0x1e9   :  { %v413_v24 = vmul.f32 %v406_v18, %v399_v20  ;;  %v400_v25 = vmul.f32 %v518_v23, %v302_v52 }
 0x1eb   :  { %v427_v27 = vadd.f32 %v420_v21, %v413_v24  ;;  %v414_v28 = vmul.f32 %v410_v22, %v400_v25 }
 0x1ed   :  { %429 = vst [vmem:[%s866_s4] sm:$0xff] %v427_v27  ;;  %v428_v29 = vadd.f32 %v424_v26, %v414_v28 }
 0x1ef   :  { %430 = vst [vmem:[%s866_s4 + $0x8] sm:$0xff] %v428_v29 }

</bundles_post_ra>
